<compile_context>
chip_gen: v5e
topology: v5e:2x2
jax: 0.10.0
libtpu: 0.0.40
codegen_flags: <defaults>
</compile_context>

<pallas_src>
import jax
import jax.numpy as jnp
from jax.experimental import pallas as pl
from jax.experimental.pallas import tpu as pltpu


def _round_up(x, m):
    return ((x + m - 1) // m) * m


def _eig_prompter_kernel(x_ref, wq_ref, bq_ref, kbd_ref, vbd_ref, gsum_ref, o_ref):
    # x_ref    : (Tm, H)        query rows (batch*seq folded into M)
    # wq_ref   : (H, H)         Wq^T, pre-scaled by 1/sqrt(hd)      (bf16)
    # bq_ref   : (1, H)         bq, pre-scaled                      (f32)
    # kbd_ref  : (H, nh*E)      block-diagonal per-head K^T         (bf16, batch-invariant)
    # vbd_ref  : (nh*E, H)      block-diagonal per-head V           (bf16, batch-invariant)
    # gsum_ref : (nh*E, nh*E)   same-head indicator (0/1)           (f32)
    # o_ref    : (Tm, H)        merged-head context, lane-dense
    x = x_ref[...].astype(jnp.bfloat16)                                    # (Tm, H)

    # Q projection: single full-width MXU matmul, f32 accumulation.
    q = jnp.dot(x, wq_ref[...], preferred_element_type=jnp.float32) + bq_ref[...]

    # All-head scores in one matmul; result is lane-dense (Tm, nh*E).
    s = jnp.dot(q.astype(jnp.bfloat16), kbd_ref[...],
                preferred_element_type=jnp.float32)

    # Segmented softmax over each head's E-lane group (f32 math).
    # Row-global max is a valid stabilizer for a per-group softmax.
    s = s - jnp.max(s, axis=-1, keepdims=True)
    e = jnp.exp(s)
    # Per-group sums broadcast back to every lane of the group via one tiny matmul
    # against the same-group indicator (avoids an in-kernel lane reshape to (Tm,nh,E)).
    denom = jnp.dot(e, gsum_ref[...], preferred_element_type=jnp.float32)
    p = e * pl.reciprocal(denom, approx=True)

    # Context: block-diagonal V lands the result directly in merged-head (Tm, H) layout.
    ctx = jnp.dot(p.astype(jnp.bfloat16), vbd_ref[...],
                  preferred_element_type=jnp.float32)
    o_ref[...] = ctx.astype(o_ref.dtype)


def eig_prompter_forward(query_features, params, num_heads):
    """query_features: (B, S, H) f32. params: eigprompt + q/k/v Linear params (PyTorch layout)."""
    B, S, H = query_features.shape
    assert H % num_heads == 0
    nh = num_heads
    hd = H // nh
    scale = 1.0 / (hd ** 0.5)
    f32, bf16 = jnp.float32, jnp.bfloat16

    eig = params["eigprompt"].astype(f32)                                  # (E, H)
    E = eig.shape[0]
    nhE = nh * E

    # --- Batch-invariant K / V hoisted out of the kernel: computed once here. ---
    k = eig @ params["wk"].astype(f32).T + params["bk"].astype(f32)        # (E, H)
    v = eig @ params["wv"].astype(f32).T + params["bv"].astype(f32)        # (E, H)

    # --- Block-diagonal packings: head split happens "for free" inside full-width
    #     MXU matmuls (no in-kernel head loop / transpose / reshape). ---
    eye_h = jnp.eye(nh, dtype=f32)
    k3 = k.reshape(E, nh, hd)
    v3 = v.reshape(E, nh, hd)
    # kbd[(n,d),(m,e)] = K[e, n*hd+d] * (n==m)   -> (H, nh*E)
    kbd = jnp.einsum("end,nm->ndme", k3, eye_h).reshape(H, nhE).astype(bf16)
    # vbd[(n,e),(m,d)] = V[e, n*hd+d] * (n==m)   -> (nh*E, H)
    vbd = jnp.einsum("end,nm->nemd", v3, eye_h).reshape(nhE, H).astype(bf16)
    # Same-head indicator for the segmented softmax denominator.
    gsum = jnp.kron(eye_h, jnp.ones((E, E), f32))                          # (nh*E, nh*E)

    # --- Pre-transposed, pre-scaled Q projection weights / bias. ---
    wq_t = (params["wq"].astype(f32).T * scale).astype(bf16)               # (H, H)
    bq = (params["bq"].astype(f32) * scale).reshape(1, H)                  # (1, H)

    # --- Fold (batch, seq) into one MXU M dimension and tile it. ---
    M = B * S
    x_flat = query_features.reshape(M, H)
    if M >= 1024:
        Tm = 512                                  # near the HBM roofline sweet spot
    elif M >= 256:
        Tm = _round_up(-(-M // 2), 8)             # keep >=2 grid steps (v7x has 2 TCs)
    else:
        Tm = _round_up(M, 8)                      # tiny problem: one tile
    M_pad = _round_up(M, Tm)
    if M_pad != M:
        x_flat = jnp.pad(x_flat, ((0, M_pad - M), (0, 0)))

    # Explicit VMEM budget: double-buffered x/out tiles + the (constant-index) operands.
    out_dtype = query_features.dtype
    vmem_est = (2 * Tm * H * (x_flat.dtype.itemsize + jnp.dtype(out_dtype).itemsize)
                + 2 * (kbd.size + vbd.size + wq_t.size) * 2
                + 2 * (gsum.size + bq.size) * 4)
    vmem_limit = int(min(64 * 2**20, max(32 * 2**20, 2 * vmem_est)))

    out = pl.pallas_call(
        _eig_prompter_kernel,
        out_shape=jax.ShapeDtypeStruct((M_pad, H), out_dtype),
        grid_spec=pltpu.PrefetchScalarGridSpec(
            num_scalar_prefetch=0,
            grid=(M_pad // Tm,),
            in_specs=[
                pl.BlockSpec((Tm, H), lambda i: (i, 0)),        # query rows
                pl.BlockSpec((H, H), lambda i: (0, 0)),         # Wq^T (pre-scaled)
                pl.BlockSpec((1, H), lambda i: (0, 0)),         # bq   (pre-scaled)
                pl.BlockSpec((H, nhE), lambda i: (0, 0)),       # block-diag K^T
                pl.BlockSpec((nhE, H), lambda i: (0, 0)),       # block-diag V
                pl.BlockSpec((nhE, nhE), lambda i: (0, 0)),     # same-head indicator
            ],
            out_specs=pl.BlockSpec((Tm, H), lambda i: (i, 0)),  # lane-dense merged heads
        ),
        compiler_params=pltpu.CompilerParams(
            dimension_semantics=("parallel",),
            vmem_limit_bytes=vmem_limit,
        ),
    )(x_flat, wq_t, bq, kbd, vbd, gsum)

    return out[:M].reshape(B, S, H)


def _reference_forward(x, params, num_heads):
    """Pure-JAX f32 reference mirroring HF BertSelfAttention cross-attention."""
    B, S, H = x.shape
    hd = H // num_heads
    eig = params["eigprompt"]
    q = x @ params["wq"].T + params["bq"]
    k = eig @ params["wk"].T + params["bk"]
    v = eig @ params["wv"].T + params["bv"]
    qh = q.reshape(B, S, num_heads, hd).transpose(0, 2, 1, 3)
    kh = k.reshape(1, -1, num_heads, hd).transpose(0, 2, 1, 3)
    vh = v.reshape(1, -1, num_heads, hd).transpose(0, 2, 1, 3)
    scores = jnp.einsum("bhsd,bhed->bhse", qh, kh) / jnp.sqrt(jnp.float32(hd))
    probs = jax.nn.softmax(scores, axis=-1)
    ctx = jnp.einsum("bhse,bhed->bhsd", probs, vh)
    return ctx.transpose(0, 2, 1, 3).reshape(B, S, H)


if __name__ == "__main__":
    # Small shapes consistent with the module's forward:
    B, S, H = 2, 8, 32          # batch, seq, hidden (feature_size = hidden_size = 32)
    num_heads = 4               # config.num_attention_heads
    eig_num = 10                # default eig_num

    key = jax.random.PRNGKey(0)
    k_x, k_e, k_wq, k_bq, k_wk, k_bk, k_wv, k_bv = jax.random.split(key, 8)

    x = jax.random.normal(k_x, (B, S, H), dtype=jnp.float32)

    # Deterministic synthetic parameter init (nn.Embedding ~ N(0,1); Linear ~ small uniform).
    params = {
        "eigprompt": jax.random.normal(k_e, (eig_num, H), dtype=jnp.float32),
        "wq": jax.random.uniform(k_wq, (H, H), jnp.float32, -0.1, 0.1),
        "bq": jax.random.uniform(k_bq, (H,), jnp.float32, -0.1, 0.1),
        "wk": jax.random.uniform(k_wk, (H, H), jnp.float32, -0.1, 0.1),
        "bk": jax.random.uniform(k_bk, (H,), jnp.float32, -0.1, 0.1),
        "wv": jax.random.uniform(k_wv, (H, H), jnp.float32, -0.1, 0.1),
        "bv": jax.random.uniform(k_bv, (H,), jnp.float32, -0.1, 0.1),
    }
    # TODO(synk): 'orthogo' Gram-Schmidt init and checkpoint-based 'definition' init are
    # host-side __init__ paths (not forward compute); synthetic random init used instead.

    out = eig_prompter_forward(x, params, num_heads)
    out = jax.block_until_ready(out)

    ref = _reference_forward(x, params, num_heads)
    assert out.shape == (B, S, H)
    # bf16 MXU inputs + approx reciprocal -> relaxed tolerance vs the f32 reference.
    assert jnp.allclose(out, ref, rtol=2e-2, atol=2e-2), "mismatch vs pure-JAX reference"

    print("KERNEL_OK")
</pallas_src>

<mosaic_0001>
module attributes {stable_mosaic.version = 11 : i64} {
  func.func @_eig_prompter_kernel(%arg0: i32, %arg1: memref<16x32xf32, #tpu.memory_space<vmem>>, %arg2: memref<32x32xbf16, #tpu.memory_space<vmem>>, %arg3: memref<1x32xf32, #tpu.memory_space<vmem>>, %arg4: memref<32x40xbf16, #tpu.memory_space<vmem>>, %arg5: memref<40x32xbf16, #tpu.memory_space<vmem>>, %arg6: memref<40x40xf32, #tpu.memory_space<vmem>>, %arg7: memref<16x32xf32, #tpu.memory_space<vmem>>) attributes {dimension_semantics = [#tpu.dimension_semantics<parallel>], iteration_bounds = array<i64: 1>, scalar_prefetch = 0 : i64, scratch_operands = 0 : i64, tpu.core_type = #tpu.core_type<tc>, window_params = [{transform_indices = @transform_0, window_bounds = array<i64: 16, 32>}, {pipeline_mode = #tpu.pipeline_mode<synchronous>, transform_indices = @transform_1, window_bounds = array<i64: 32, 32>}, {pipeline_mode = #tpu.pipeline_mode<synchronous>, transform_indices = @transform_2, window_bounds = array<i64: 1, 32>}, {pipeline_mode = #tpu.pipeline_mode<synchronous>, transform_indices = @transform_3, window_bounds = array<i64: 32, 40>}, {pipeline_mode = #tpu.pipeline_mode<synchronous>, transform_indices = @transform_4, window_bounds = array<i64: 40, 32>}, {pipeline_mode = #tpu.pipeline_mode<synchronous>, transform_indices = @transform_5, window_bounds = array<i64: 40, 40>}, {transform_indices = @transform_6, window_bounds = array<i64: 16, 32>}]} {
    %c0 = arith.constant 0 : index
    %c0_0 = arith.constant 0 : index
    %0 = vector.load %arg1[%c0, %c0_0] : memref<16x32xf32, #tpu.memory_space<vmem>>, vector<16x32xf32>
    %1 = arith.truncf %0 : vector<16x32xf32> to vector<16x32xbf16>
    %c0_1 = arith.constant 0 : index
    %c0_2 = arith.constant 0 : index
    %2 = vector.load %arg2[%c0_1, %c0_2] : memref<32x32xbf16, #tpu.memory_space<vmem>>, vector<32x32xbf16>
    %cst = arith.constant dense<0.000000e+00> : vector<16x32xf32>
    %3 = tpu.matmul %1, %2, %cst {dimension_numbers = #tpu.dot_dimension_numbers<[1], [0], [0], [1], [0, 0, 1, 1], [], []>} : vector<16x32xbf16>, vector<32x32xbf16>, vector<16x32xf32> -> vector<16x32xf32>
    %c0_3 = arith.constant 0 : index
    %c0_4 = arith.constant 0 : index
    %4 = vector.load %arg3[%c0_3, %c0_4] : memref<1x32xf32, #tpu.memory_space<vmem>>, vector<1x32xf32>
    %5 = vector.broadcast %4 : vector<1x32xf32> to vector<16x32xf32>
    %6 = arith.addf %3, %5 : vector<16x32xf32>
    %7 = arith.truncf %6 : vector<16x32xf32> to vector<16x32xbf16>
    %c0_5 = arith.constant 0 : index
    %c0_6 = arith.constant 0 : index
    %8 = vector.load %arg4[%c0_5, %c0_6] : memref<32x40xbf16, #tpu.memory_space<vmem>>, vector<32x40xbf16>
    %cst_7 = arith.constant dense<0.000000e+00> : vector<16x40xf32>
    %9 = tpu.matmul %7, %8, %cst_7 {dimension_numbers = #tpu.dot_dimension_numbers<[1], [0], [0], [1], [0, 0, 1, 1], [], []>} : vector<16x32xbf16>, vector<32x40xbf16>, vector<16x40xf32> -> vector<16x40xf32>
    %cst_8 = arith.constant dense<0xFF800000> : vector<16xf32>
    %10 = vector.multi_reduction <maximumf>, %9, %cst_8 [1] : vector<16x40xf32> to vector<16xf32>
    %11 = vector.shape_cast %10 : vector<16xf32> to vector<16x1xf32>
    %12 = vector.broadcast %11 : vector<16x1xf32> to vector<16x40xf32>
    %13 = arith.subf %9, %12 : vector<16x40xf32>
    %14 = math.exp %13 : vector<16x40xf32>
    %c0_9 = arith.constant 0 : index
    %c0_10 = arith.constant 0 : index
    %15 = vector.load %arg6[%c0_9, %c0_10] : memref<40x40xf32, #tpu.memory_space<vmem>>, vector<40x40xf32>
    %cst_11 = arith.constant dense<0.000000e+00> : vector<16x40xf32>
    %16 = tpu.matmul %14, %15, %cst_11 {dimension_numbers = #tpu.dot_dimension_numbers<[1], [0], [0], [1], [0, 0, 1, 1], [], []>} : vector<16x40xf32>, vector<40x40xf32>, vector<16x40xf32> -> vector<16x40xf32>
    %17 = tpu.reciprocal %16 {approx = true} : vector<16x40xf32> -> vector<16x40xf32>
    %18 = arith.mulf %14, %17 : vector<16x40xf32>
    %19 = arith.truncf %18 : vector<16x40xf32> to vector<16x40xbf16>
    %c0_12 = arith.constant 0 : index
    %c0_13 = arith.constant 0 : index
    %20 = vector.load %arg5[%c0_12, %c0_13] : memref<40x32xbf16, #tpu.memory_space<vmem>>, vector<40x32xbf16>
    %cst_14 = arith.constant dense<0.000000e+00> : vector<16x32xf32>
    %21 = tpu.matmul %19, %20, %cst_14 {dimension_numbers = #tpu.dot_dimension_numbers<[1], [0], [0], [1], [0, 0, 1, 1], [], []>} : vector<16x40xbf16>, vector<40x32xbf16>, vector<16x32xf32> -> vector<16x32xf32>
    %c0_15 = arith.constant 0 : index
    %c0_16 = arith.constant 0 : index
    %22 = vector.load %arg7[%c0_15, %c0_16] : memref<16x32xf32, #tpu.memory_space<vmem>>, vector<16x32xf32>
    tpu.vector_store %arg7[%c0_15, %c0_16], %21 {strides = array<i32>} : memref<16x32xf32, #tpu.memory_space<vmem>>, vector<16x32xf32>,
    return
  }
  func.func @transform_0(%arg0: i32) -> (i32, i32) {
    %c0_i32 = arith.constant 0 : i32
    %c0_i32_0 = arith.constant 0 : i32
    return %arg0, %c0_i32 : i32, i32
  }
  func.func @transform_1(%arg0: i32) -> (i32, i32) {
    %c0_i32 = arith.constant 0 : i32
    %c0_i32_0 = arith.constant 0 : i32
    %c0_i32_1 = arith.constant 0 : i32
    return %c0_i32, %c0_i32_0 : i32, i32
  }
  func.func @transform_2(%arg0: i32) -> (i32, i32) {
    %c0_i32 = arith.constant 0 : i32
    %c0_i32_0 = arith.constant 0 : i32
    %c0_i32_1 = arith.constant 0 : i32
    return %c0_i32, %c0_i32_0 : i32, i32
  }
  func.func @transform_3(%arg0: i32) -> (i32, i32) {
    %c0_i32 = arith.constant 0 : i32
    %c0_i32_0 = arith.constant 0 : i32
    %c0_i32_1 = arith.constant 0 : i32
    return %c0_i32, %c0_i32_0 : i32, i32
  }
  func.func @transform_4(%arg0: i32) -> (i32, i32) {
    %c0_i32 = arith.constant 0 : i32
    %c0_i32_0 = arith.constant 0 : i32
    %c0_i32_1 = arith.constant 0 : i32
    return %c0_i32, %c0_i32_0 : i32, i32
  }
  func.func @transform_5(%arg0: i32) -> (i32, i32) {
    %c0_i32 = arith.constant 0 : i32
    %c0_i32_0 = arith.constant 0 : i32
    %c0_i32_1 = arith.constant 0 : i32
    return %c0_i32, %c0_i32_0 : i32, i32
  }
  func.func @transform_6(%arg0: i32) -> (i32, i32) {
    %c0_i32 = arith.constant 0 : i32
    %c0_i32_0 = arith.constant 0 : i32
    return %arg0, %c0_i32 : i32, i32
  }
}

</mosaic_0001>

<bundles_post_ra>
// kernel: tpu_custom_call.1
= control target key start
LH: loop header
LB: loop body
LE: loop exit
PB: predicated region body
PF: predicated region fallthrough
CT: control target
= control target key end

     0   :  { %11 = vsyncpa [#allocation3], 0  ;;  %s556_s0 = inlined_call_operand.hbm [shape: f32[16,32], index: 0, kind: input, shape index: {}]   ;;  %s557_s1 = inlined_call_operand.hbm [shape: bf16[32,32], index: 1, kind: input, shape index: {}]   ;;  %s558_s2 = inlined_call_operand.hbm [shape: f32[1,32], index: 2, kind: input, shape index: {}]   ;;  %s559_s3 = inlined_call_operand.hbm [shape: bf16[32,40], index: 3, kind: input, shape index: {}]   ;;  %s560_s4 = inlined_call_operand.vmem [shape: bf16[40,32], index: 4, kind: input, shape index: {}]   ;;  %s561_s5 = inlined_call_operand.vmem [shape: f32[40,40], index: 5, kind: input, shape index: {}]   ;;  %s562_s6 = inlined_call_operand.hbm [shape: f32[16,32], index: 6, kind: output, shape index: {}]  }
   0x1   :  { %12 = vsyncpa [#allocation6], 0 }
   0x2   :  { %13 = vsyncpa [#allocation9], 0  ;;  %s32_s23 = sshll.u32 %s557_s1, 4  ;;  %s33_s23 = int_to_ptr.hbm [resolvable:$true] %s32_s23 }
   0x3   :  { %14 = vsyncpa [#allocation4], 0  ;;  %s458_s24 = smov [#allocation5]   ;;  %s19_s28 = sshll.u32 %s556_s0, 4  ;;  %s20_s28 = int_to_ptr.hbm [resolvable:$true] %s19_s28 }
   0x4   :  { %s34_s25 = sshll.u32 %s458_s24, 4  ;;  %s459_s29 = smov 64   ;;  %s35_s25 = int_to_ptr.vmem [resolvable:$true] %s34_s25 }
   0x5   :  { %s460_s30 = smov 4   ;;  %s461_s7 = smov [#allocation2]  }
   0x6   :  { %40 = dma.hbm_to_vmem [thread:$0]  %s33_s23, 256, %s35_s25, [#allocation6], %s459_s29, %s459_s29, %s460_s30  }
   0x7   :  { %s21_s8 = sshll.u32 %s461_s7, 4  ;;  %s462_s9 = smov 128   ;;  %s22_s8 = int_to_ptr.vmem [resolvable:$true] %s21_s8 }
   0x8   :  { %s463_s10 = smov 8   ;;  %s46_s12 = sshll.u32 %s558_s2, 4  ;;  %s47_s12 = int_to_ptr.hbm [resolvable:$true] %s46_s12 }
   0x9   :  { %27 = dma.hbm_to_vmem [thread:$0]  %s20_s28, 256, %s22_s8, [#allocation3], %s462_s9, %s462_s9, %s463_s10  }
   0xa   :  { %s464_s13 = smov [#allocation7]   ;;  %s56_s16 = sshll.u32 %s559_s3, 4  ;;  %s57_s16 = int_to_ptr.hbm [resolvable:$true] %s56_s16 }
   0xb   :  { %s48_s0 = sshll.u32 %s464_s13, 4  ;;  %s465_s17 = smov [#allocation8]   ;;  %s49_s0 = int_to_ptr.vmem [resolvable:$true] %s48_s0 }
   0xc   :  { %51 = dma.hbm_to_vmem [thread:$0]  %s47_s12, 16, %s49_s0, [#allocation6]  }
   0xd   :  { %s58_s18 = sshll.u32 %s465_s17, 4  ;;  %s59_s18 = int_to_ptr.vmem [resolvable:$true] %s58_s18 }
   0xe   :  { %64 = dma.hbm_to_vmem [thread:$0]  %s57_s16, 256, %s59_s18, [#allocation9], %s459_s29, %s459_s29, %s460_s30  }
   0xf   :  { %450 = dma.done.wait [#allocation3], 256  }
  0x10   :  { %451 = vsyncadd [#allocation3], 4294967040 }
  0x11   :  { %452 = dma.done.wait [#allocation6], 272  }
  0x12   :  { %453 = vsyncadd [#allocation6], 4294967024 }
  0x13   :  { %454 = dma.done.wait [#allocation9], 256  }
  0x14   :  { %455 = vsyncadd [#allocation9], 4294967040  ;;  %v307_v0 = vld [vmem:[#allocation5 + $0x8] sm:$0xff]  ;;  %v306_v1 = vld [vmem:[#allocation5] sm:$0xff]  ;;  %vm109_vm0 = vcmask 261120   ;;  %vm161_vm1 = vcmask 326656  }
  0x15   :  { %119 = vmatpush.bf16.msra.mxu0 %v307_v0  ;;  %v86_v2 = vld [vmem:[#allocation2] sm:$0xff]  ;;  %v87_v3 = vld [vmem:[#allocation2 + $0x8] sm:$0xff]  ;;  %v177_v18 = vld [vmem:[%s561_s5 + $0x18] sm:$0xff]  ;;  %vm236_vm2 = vcmask 1043456   ;;  %s466_s8 = smov [#allocation10]  }
  0x16   :  { %v88_v4 = vpack.c.bf16 %v87_v3, %v86_v2  ;;  %v309_v5 = vld [vmem:[#allocation8 + $0x8] sm:$0xff]  ;;  %v308_v6 = vld [vmem:[#allocation8] sm:$0xff]  ;;  %v321_v8 = vld [vmem:[#allocation7] ss:$0 sm:$0xff]  ;;  %s260_s1 = sshll.u32 %s466_s8, 4  ;;  %s261_s1 = int_to_ptr.vmem [resolvable:$true] %s260_s1 }
  0x17   :  { %153 = vmatpush.bf16.msra.mxu1 %v309_v5  ;;  %v178_v17 = vld [vmem:[%s561_s5 + $0x20] sm:$0xff]  ;;  %v176_v19 = vld [vmem:[%s561_s5 + $0x10] sm:$0xff]  ;;  %v175_v20 = vld [vmem:[%s561_s5 + $0x8] sm:$0xff] }
  0x18   :  { %196 = vmatpush.msra.mxu2 %v178_v17  ;;  %v174_v21 = vld [vmem:[%s561_s5] sm:$0xff]  ;;  %v217_v30 = vld [vmem:[%s560_s4 + $0x10] sm:$0xf]  ;;  %v311_v34 = vld [vmem:[%s560_s4 + $0x8] sm:$0xff] }
  0x19   :  { %120 = vmatpush.bf16.msra.mxu0 %v306_v1  ;;  %v227_v31 = vunpack.c.l.b16 %v217_v30  ;;  %v310_v35 = vld [vmem:[%s560_s4] sm:$0xff]  ;;  %s262_s4 = sshll.u32 %s562_s6, 4  ;;  %s263_s4 = int_to_ptr.hbm [resolvable:$true] %s262_s4 }
  0x1a   :  { %197 = vmatpush.msra.mxu2 %v177_v18 }
  0x1b   :  { %154 = vmatpush.bf16.msra.mxu1 %v308_v6  ;;  %v230_v32 = vpack.c.b16 %v227_v31, %v227_v31 }
  0x1c   :  { %285 = vmatmul.msk.bf16.vlgmr.msra.gmra.mxu0 %vm109_vm0, %v88_v4  ;;  %198 = vmatpush.msra.mxu2 %v176_v19 }
  0x1d   :  { %v238_v33 = vsel %vm236_vm2, %v230_v32, 0 }
  0x1e   :  { %199 = vmatpush.msra.mxu2 %v175_v20  ;;  %245 = vmatpush.bf16.msra.mxu3 %v238_v33 }
  0x20   :  { %200 = vmatpush.msra.mxu2 %v174_v21 }
  0x22   :  { %246 = vmatpush.bf16.msra.mxu3 %v311_v34 }
  0x26   :  { %247 = vmatpush.bf16.msra.mxu3 %v310_v35 }
  0x99   :  { %v122_v7 = vpop.f32.mrf.mxu0 }
  0x9a   :  { %v123_v10 = vadd.f32 %v321_v8, %v122_v7 }
  0xa1   :  { %v124_v9 = vpop.f32.mrf.mxu0 }
  0xa2   :  { %v125_v11 = vadd.f32 %v321_v8, %v124_v9 }
  0xa4   :  { %v127_v12 = vpack.c.bf16 %v125_v11, %v123_v10 }
  0xa6   :  { %294 = vmatmul.msk.bf16.vlgmr.msra.gmra.mxu1 %vm109_vm0, %v127_v12 }
 0x123   :  { %v156_v13 = vpop.f32.mrf.mxu1 }
 0x124   :  { %v162_v14 = vsel %vm161_vm1, %v156_v13, -inf }
 0x125   :  { %163 = vmax.xlane.f32.xlu0 %v162_v14 }
 0x12b   :  { %v158_v15 = vpop.f32.mrf.mxu1 }
 0x12c   :  { %v165_v16 = vsel %vm161_vm1, %v158_v15, -inf }
 0x12d   :  { %166 = vmax.xlane.f32.xlu0 %v165_v16 }
 0x198   :  { %v164_v22 = vpop.xlane.xlu0 %163 }
 0x199   :  { %v168_v23 = vsub.f32 %v156_v13, %v164_v22 }
 0x19b   :  { %v170_v24 = vmul.f32 1.442695, %v168_v23 }
 0x19d   :  { %322 = vpow2.f32 %v170_v24 }
 0x1a0   :  { %v167_v25 = vpop.xlane.xlu0 %166 }
 0x1a1   :  { %v169_v26 = vsub.f32 %v158_v15, %v167_v25 }
 0x1a3   :  { %v323_v27 = vpop.eup %322  ;;  %v172_v28 = vmul.f32 1.442695, %v169_v26 }
 0x1a4   :  { %295 = vmatmul.msk.f32.vlgmr.msra.gmra.mxu2 %vm161_vm1, %v323_v27 }
 0x1a5   :  { %324 = vpow2.f32 %v172_v28 }
 0x1ab   :  { %v325_v29 = vpop.eup %324 }
 0x1ac   :  { %296 = vmatmul.msk.f32.gmra.mxu2 %vm161_vm1, %v325_v29 }
 0x227   :  { %v202_v36 = vpop.f32.mrf.mxu2 }
 0x228   :  { %326 = vrcp.f32 %v202_v36 }
 0x22e   :  { %v327_v38 = vpop.eup %326 }
 0x22f   :  { %v205_v37 = vpop.f32.mrf.mxu2  ;;  %v210_v40 = vmul.f32 %v327_v38, %v323_v27 }
 0x230   :  { %328 = vrcp.f32 %v205_v37 }
 0x236   :  { %v329_v39 = vpop.eup %328 }
 0x237   :  { %v211_v41 = vmul.f32 %v329_v39, %v325_v29 }
 0x239   :  { %v212_v42 = vpack.c.bf16 %v211_v41, %v210_v40 }
 0x23b   :  { %305 = vmatmul.msk.bf16.vlgmr.msra.gmra.mxu3 %vm161_vm1, %v212_v42 }
 0x2be   :  { %v249_v43 = vpop.f32.mrf.mxu3 }
 0x2bf   :  { %254 = vst.msk [vmem:[#allocation10] sm:$0xff] %vm109_vm0, %v249_v43 }
 0x2c6   :  { %v251_v44 = vpop.f32.mrf.mxu3 }
 0x2c7   :  { %255 = vst.msk [vmem:[#allocation10 + $0x8] sm:$0xff] %vm109_vm0, %v251_v44 }
 0x2c8   :  { %268 = dma.vmem_to_hbm [thread:$0]  %s261_s1, 256, %s263_s4, [#allocation4], %s462_s9, %s462_s9, %s463_s10  }
 0x2c9   :  { %456 = dma.done.wait [#allocation4], 256  }
 0x2ca   :  { %457 = vsyncadd [#allocation4], 4294967040 }
 0x2cb   :  { %273 = vsyncpa [#allocation3], 1 }
 0x2cc   :  { %274 = vsyncpa [#allocation6], 1 }
 0x2cd   :  { %275 = vsyncpa [#allocation9], 1 }
 0x2ce   :  { %276 = vsyncpa [#allocation4], 1 }

</bundles_post_ra>
